<compile_context>
chip_gen: v5e
topology: v5e:2x2
jax: 0.10.0
libtpu: 0.0.40
codegen_flags: <defaults>
</compile_context>

<pallas_src>
import functools

import jax
import jax.numpy as jnp
from jax.experimental import pallas as pl
from jax.experimental.pallas import tpu as pltpu


# ---------------------------------------------------------------------------
# Kernel
# ---------------------------------------------------------------------------
def _classifier_kernel(x_ref, w_ref, b_ref, o_ref, acc_ref):
    """One (TM, TK) x-tile @ (TK, L_pad) w-stripe, accumulated over the K grid axis.

    x_ref:   (TM, TK)      activations tile
    w_ref:   (TK, L_pad)   pre-transposed, lane-padded weight stripe
    b_ref:   (1,  L_pad)   lane-padded bias
    o_ref:   (TM, L_pad)   output logits tile (written on last K step only)
    acc_ref: (TM, L_pad)   f32 VMEM accumulator (resident across the K axis)
    """
    k = pl.program_id(1)

    @pl.when(k == 0)
    def _():
        acc_ref[...] = jnp.zeros_like(acc_ref)

    acc_ref[...] += jnp.dot(
        x_ref[...], w_ref[...], preferred_element_type=jnp.float32
    )

    @pl.when(k == pl.num_programs(1) - 1)
    def _():
        o_ref[...] = (acc_ref[...] + b_ref[...].astype(jnp.float32)).astype(o_ref.dtype)


# ---------------------------------------------------------------------------
# Parameter preparation (run once, outside the hot path — replaces per-call weight.T)
# ---------------------------------------------------------------------------
def prepare_classifier_params(weight, bias):
    """weight: (L, H) PyTorch nn.Linear layout; bias: (L,).

    Returns (w_t_pad, b_pad, num_labels) where
      w_t_pad: (H, L_pad) — transposed + zero-padded to a multiple of 128 lanes
      b_pad:   (1, L_pad)
    """
    L, H = weight.shape
    l_pad = max(128, ((L + 127) // 128) * 128)
    w_t_pad = jnp.zeros((H, l_pad), dtype=weight.dtype).at[:, :L].set(weight.T)
    b_pad = jnp.zeros((1, l_pad), dtype=bias.dtype).at[0, :L].set(bias)
    return w_t_pad, b_pad, L


def _pick_batch_tile(batch, preferred=512):
    # Second-to-last block dim must be a multiple of 8 or equal to the full dim.
    if batch <= preferred:
        return batch
    return preferred  # multiple of 8; partial last block is masked by Pallas.


def _pick_k_tile(hidden, preferred=2048):
    # Reduction axis: tile must divide H exactly (no padded garbage in the contraction).
    if hidden <= preferred:
        return hidden
    for cand in (2048, 1024, 512, 256, 128):
        if hidden % cand == 0:
            return cand
    return hidden  # fallback: single K step


# ---------------------------------------------------------------------------
# Forward on pre-prepared (padded / transposed) parameters
# ---------------------------------------------------------------------------
@functools.partial(jax.jit, static_argnames=("num_labels",))
def classifier_forward_prepared(document_representation, w_t_pad, b_pad, num_labels):
    B, H = document_representation.shape
    H_w, L_pad = w_t_pad.shape
    assert H_w == H

    tm = _pick_batch_tile(B)
    tk = _pick_k_tile(H)
    grid = (pl.cdiv(B, tm), H // tk)

    itemsize = jnp.dtype(document_representation.dtype).itemsize
    cost = pl.CostEstimate(
        flops=2 * B * H * L_pad,
        transcendentals=0,
        bytes_accessed=(
            B * H * itemsize
            + H * L_pad * jnp.dtype(w_t_pad.dtype).itemsize
            + L_pad * jnp.dtype(b_pad.dtype).itemsize
            + B * L_pad * itemsize
        ),
    )

    logits_pad = pl.pallas_call(
        _classifier_kernel,
        out_shape=jax.ShapeDtypeStruct((B, L_pad), document_representation.dtype),
        grid=grid,
        in_specs=[
            pl.BlockSpec((tm, tk), lambda i, k: (i, k)),      # x tile
            pl.BlockSpec((tk, L_pad), lambda i, k: (k, 0)),   # weight stripe
            pl.BlockSpec((1, L_pad), lambda i, k: (0, 0)),    # bias (constant)
        ],
        out_specs=pl.BlockSpec((tm, L_pad), lambda i, k: (i, 0)),
        scratch_shapes=[pltpu.VMEM((tm, L_pad), jnp.float32)],
        compiler_params=pltpu.CompilerParams(
            dimension_semantics=("parallel", "arbitrary"),
        ),
        cost_estimate=cost,
    )(document_representation, w_t_pad, b_pad)

    # Drop the lane padding before any downstream softmax/argmax.
    return logits_pad[:, :num_labels]


# ---------------------------------------------------------------------------
# Convenience wrapper matching the PyTorch module signature
# ---------------------------------------------------------------------------
def document_classifier_forward(document_representation, weight, bias):
    """logits = document_representation @ weight.T + bias  (nn.Linear semantics)."""
    w_t_pad, b_pad, L = prepare_classifier_params(weight, bias)
    return classifier_forward_prepared(document_representation, w_t_pad, b_pad, L)


if __name__ == "__main__":
    # Small shapes consistent with the module's forward:
    #   document_representation: (batch, hidden_size)
    batch = 8
    hidden_size = 32
    num_labels = 8

    key = jax.random.PRNGKey(0)
    k_x, k_w, k_b = jax.random.split(key, 3)

    x = jax.random.normal(k_x, (batch, hidden_size), dtype=jnp.float32)
    # Deterministic synthetic parameters (nn.Linear shapes: weight (L, H), bias (L,)).
    weight = jax.random.normal(k_w, (num_labels, hidden_size), dtype=jnp.float32) * 0.02
    bias = jax.random.normal(k_b, (num_labels,), dtype=jnp.float32) * 0.02

    logits = document_classifier_forward(x, weight, bias)
    logits = jax.block_until_ready(logits)

    # Reference check against plain JAX (same math as torch nn.Linear).
    ref = x @ weight.T + bias
    assert logits.shape == (batch, num_labels)
    assert jnp.allclose(logits, ref, atol=1e-5, rtol=1e-5)

    print("KERNEL_OK")
</pallas_src>

<mosaic_0001>
module attributes {stable_mosaic.version = 11 : i64} {
  func.func @_classifier_kernel(%arg0: i32, %arg1: i32, %arg2: memref<8x32xf32, #tpu.memory_space<vmem>>, %arg3: memref<32x128xf32, #tpu.memory_space<vmem>>, %arg4: memref<1x128xf32, #tpu.memory_space<vmem>>, %arg5: memref<8x128xf32, #tpu.memory_space<vmem>>, %arg6: memref<8x128xf32, #tpu.memory_space<vmem>>) attributes {dimension_semantics = [#tpu.dimension_semantics<parallel>, #tpu.dimension_semantics<arbitrary>], iteration_bounds = array<i64: 1, 1>, scalar_prefetch = 0 : i64, scratch_operands = 1 : i64, tpu.core_type = #tpu.core_type<tc>, window_params = [{transform_indices = @transform_0, window_bounds = array<i64: 8, 32>}, {transform_indices = @transform_1, window_bounds = array<i64: 32, 128>}, {pipeline_mode = #tpu.pipeline_mode<synchronous>, transform_indices = @transform_2, window_bounds = array<i64: 1, 128>}, {transform_indices = @transform_3, window_bounds = array<i64: 8, 128>}]} {
    %c0_i32 = arith.constant 0 : i32
    %0 = arith.cmpi eq, %arg1, %c0_i32 : i32
    %1 = arith.extui %0 : i1 to i32
    %c0_i32_0 = arith.constant 0 : i32
    %2 = arith.cmpi ne, %1, %c0_i32_0 : i32
    scf.if %2 {
      %cst_10 = arith.constant 0.000000e+00 : f32
      %12 = vector.broadcast %cst_10 : f32 to vector<8x128xf32>
      %c0_11 = arith.constant 0 : index
      %c0_12 = arith.constant 0 : index
      %13 = vector.load %arg6[%c0_11, %c0_12] : memref<8x128xf32, #tpu.memory_space<vmem>>, vector<8x128xf32>
      tpu.vector_store %arg6[%c0_11, %c0_12], %12 {strides = array<i32>} : memref<8x128xf32, #tpu.memory_space<vmem>>, vector<8x128xf32>,
    } else {
    }
    %c0 = arith.constant 0 : index
    %c0_1 = arith.constant 0 : index
    %3 = vector.load %arg6[%c0, %c0_1] : memref<8x128xf32, #tpu.memory_space<vmem>>, vector<8x128xf32>
    %c0_2 = arith.constant 0 : index
    %c0_3 = arith.constant 0 : index
    %4 = vector.load %arg2[%c0_2, %c0_3] : memref<8x32xf32, #tpu.memory_space<vmem>>, vector<8x32xf32>
    %c0_4 = arith.constant 0 : index
    %c0_5 = arith.constant 0 : index
    %5 = vector.load %arg3[%c0_4, %c0_5] : memref<32x128xf32, #tpu.memory_space<vmem>>, vector<32x128xf32>
    %cst = arith.constant dense<0.000000e+00> : vector<8x128xf32>
    %6 = tpu.matmul %4, %5, %cst {dimension_numbers = #tpu.dot_dimension_numbers<[1], [0], [0], [1], [0, 0, 1, 1], [], []>} : vector<8x32xf32>, vector<32x128xf32>, vector<8x128xf32> -> vector<8x128xf32>
    %7 = arith.addf %3, %6 : vector<8x128xf32>
    %c0_6 = arith.constant 0 : index
    %c0_7 = arith.constant 0 : index
    %8 = vector.load %arg6[%c0_6, %c0_7] : memref<8x128xf32, #tpu.memory_space<vmem>>, vector<8x128xf32>
    tpu.vector_store %arg6[%c0_6, %c0_7], %7 {strides = array<i32>} : memref<8x128xf32, #tpu.memory_space<vmem>>, vector<8x128xf32>,
    %c0_i32_8 = arith.constant 0 : i32
    %9 = arith.cmpi eq, %arg1, %c0_i32_8 : i32
    %10 = arith.extui %9 : i1 to i32
    %c0_i32_9 = arith.constant 0 : i32
    %11 = arith.cmpi ne, %10, %c0_i32_9 : i32
    scf.if %11 {
      %c0_10 = arith.constant 0 : index
      %c0_11 = arith.constant 0 : index
      %12 = vector.load %arg6[%c0_10, %c0_11] : memref<8x128xf32, #tpu.memory_space<vmem>>, vector<8x128xf32>
      %c0_12 = arith.constant 0 : index
      %c0_13 = arith.constant 0 : index
      %13 = vector.load %arg4[%c0_12, %c0_13] : memref<1x128xf32, #tpu.memory_space<vmem>>, vector<1x128xf32>
      %14 = vector.broadcast %13 : vector<1x128xf32> to vector<8x128xf32>
      %15 = arith.addf %12, %14 : vector<8x128xf32>
      %c0_14 = arith.constant 0 : index
      %c0_15 = arith.constant 0 : index
      %16 = vector.load %arg5[%c0_14, %c0_15] : memref<8x128xf32, #tpu.memory_space<vmem>>, vector<8x128xf32>
      tpu.vector_store %arg5[%c0_14, %c0_15], %15 {strides = array<i32>} : memref<8x128xf32, #tpu.memory_space<vmem>>, vector<8x128xf32>,
    } else {
    }
    return
  }
  func.func @transform_0(%arg0: i32, %arg1: i32) -> (i32, i32) {
    %c0_i32 = arith.constant 0 : i32
    return %arg0, %arg1 : i32, i32
  }
  func.func @transform_1(%arg0: i32, %arg1: i32) -> (i32, i32) {
    %c0_i32 = arith.constant 0 : i32
    %c0_i32_0 = arith.constant 0 : i32
    return %arg1, %c0_i32 : i32, i32
  }
  func.func @transform_2(%arg0: i32, %arg1: i32) -> (i32, i32) {
    %c0_i32 = arith.constant 0 : i32
    %c0_i32_0 = arith.constant 0 : i32
    %c0_i32_1 = arith.constant 0 : i32
    return %c0_i32, %c0_i32_0 : i32, i32
  }
  func.func @transform_3(%arg0: i32, %arg1: i32) -> (i32, i32) {
    %c0_i32 = arith.constant 0 : i32
    %c0_i32_0 = arith.constant 0 : i32
    return %arg0, %c0_i32 : i32, i32
  }
}

</mosaic_0001>

<bundles_post_ra>
// kernel: classifier_forward_prepared.1
= control target key start
LH: loop header
LB: loop body
LE: loop exit
PB: predicated region body
PF: predicated region fallthrough
CT: control target
= control target key end

     0   :  { %8 = vsyncpa [#allocation4], 0  ;;  %s232_s0 = inlined_call_operand.hbm [shape: f32[8,32], index: 0, kind: input, shape index: {}]   ;;  %s233_s1 = inlined_call_operand.hbm [shape: f32[32,128], index: 1, kind: input, shape index: {}]   ;;  %s234_s2 = inlined_call_operand.vmem [shape: f32[1,128], index: 2, kind: input, shape index: {}]   ;;  %s235_s3 = inlined_call_operand.hbm [shape: f32[8,128], index: 3, kind: output, shape index: {}]  }
   0x1   :  { %9 = vsyncpa [#allocation7], 0 }
   0x2   :  { %10 = vsyncpa [#allocation5], 0  ;;  %s16_s14 = sshll.u32 %s232_s0, 4  ;;  %s195_s15 = smov [#allocation3]   ;;  %s17_s14 = int_to_ptr.hbm [resolvable:$true] %s16_s14 }
   0x3   :  { %s18_s16 = sshll.u32 %s195_s15, 4  ;;  %s26_s19 = sshll.u32 %s233_s1, 4  ;;  %s19_s16 = int_to_ptr.vmem [resolvable:$true] %s18_s16  ;;  %s27_s19 = int_to_ptr.hbm [resolvable:$true] %s26_s19 }
   0x4   :  { %21 = dma.hbm_to_vmem [thread:$0]  %s17_s14, 128, %s19_s16, [#allocation4]  }
   0x5   :  { %s196_s20 = smov [#allocation6]   ;;  %s197_s22 = smov 128  }
   0x6   :  { %s28_s21 = sshll.u32 %s196_s20, 4  ;;  %s198_s23 = smov 8   ;;  %s29_s21 = int_to_ptr.vmem [resolvable:$true] %s28_s21 }
   0x7   :  { %34 = dma.hbm_to_vmem [thread:$0]  %s27_s19, 512, %s29_s21, [#allocation7], %s197_s22, %s197_s22, %s198_s23  }
   0x8   :  { %189 = dma.done.wait [#allocation4], 128  }
   0x9   :  { %190 = vsyncadd [#allocation4], 4294967168 }
   0xa   :  { %191 = dma.done.wait [#allocation7], 512  }
   0xb   :  { %192 = vsyncadd [#allocation7], 4294966784  ;;  %v55_v0 = vld [vmem:[#allocation6 + $0x18] sm:$0xff]  ;;  %v54_v1 = vld [vmem:[#allocation6 + $0x10] sm:$0xff]  ;;  %vm56_vm0 = vcmask 261120   ;;  %s199_s24 = smov [#allocation8]  }
   0xc   :  { %72 = vmatpush.msra.mxu0 %v55_v0  ;;  %v53_v2 = vld [vmem:[#allocation6 + $0x8] sm:$0xff]  ;;  %v52_v3 = vld [vmem:[#allocation6] sm:$0xff]  ;;  %v51_v4 = vld [vmem:[#allocation3] sm:$0xff]  ;;  %s97_s25 = sshll.u32 %s199_s24, 4  ;;  %s99_s28 = sshll.u32 %s235_s3, 4  ;;  %s98_s25 = int_to_ptr.vmem [resolvable:$true] %s97_s25  ;;  %s100_s28 = int_to_ptr.hbm [resolvable:$true] %s99_s28 }
   0xd   :  { %v116_v5 = vld [vmem:[%s234_s2] ss:$0 sm:$0xff] }
   0xe   :  { %73 = vmatpush.msra.mxu0 %v54_v1 }
  0x10   :  { %74 = vmatpush.msra.mxu0 %v53_v2 }
  0x12   :  { %75 = vmatpush.msra.mxu0 %v52_v3 }
  0x13   :  { %110 = vmatmul.msk.f32.vlgmr.msra.gmra.mxu0 %vm56_vm0, %v51_v4 }
  0x90   :  { %v77_v6 = vpop.f32.mrf.mxu0 }
  0x91   :  { %v90_v7 = vadd.f32 %v116_v5, %v77_v6 }
  0x93   :  { %91 = vst [vmem:[#allocation8] sm:$0xff] %v90_v7 }
  0x94   :  { %102 = dma.vmem_to_hbm [thread:$0]  %s98_s25, 128, %s100_s28, [#allocation5]  }
  0x95   :  { %193 = dma.done.wait [#allocation5], 128  }
  0x96   :  { %194 = vsyncadd [#allocation5], 4294967168 }
  0x97   :  { %107 = vsyncpa [#allocation4], 1 }
  0x98   :  { %108 = vsyncpa [#allocation7], 1 }
  0x99   :  { %109 = vsyncpa [#allocation5], 1 }

</bundles_post_ra>
